<compile_context>
chip_gen: v6e
topology: v6e:2x2x1
jax: 0.10.0
libtpu: 0.0.40
codegen_flags: <defaults>
</compile_context>

<pallas_src>
import functools

import jax
import jax.numpy as jnp
from jax.experimental import pallas as pl
from jax.experimental.pallas import tpu as pltpu

_LANES = 128


def _make_hist_kernel(*, n_classes: int, tile_r: int, n_valid: int,
                      always_full: bool):
    """Per-step: argmax over classes + masked per-class (count, pos) histograms."""
    C = n_classes

    def kernel(x_ref, y_ref, pos_ref, cnt_ref):
        t = pl.program_id(1)

        # --- init resident output accumulators (per parallel slice) --------
        @pl.when(t == 0)
        def _init():
            pos_ref[...] = jnp.zeros_like(pos_ref)
            cnt_ref[...] = jnp.zeros_like(cnt_ref)

        # --- argmax over the (small) class axis, unrolled: pure VPU --------
        # Compares run in the input's native dtype (bf16-capable VALUs on
        # v6e/v7x; compiler inserts conversions where needed on v5e).
        max_val = x_ref[0]                              # (tile_r, 128)
        pred = jnp.zeros((tile_r, _LANES), jnp.int32)
        for c in range(1, C):
            xc = x_ref[c]
            take = xc > max_val
            max_val = jnp.where(take, xc, max_val)
            pred = jnp.where(take, jnp.int32(c), pred)

        yf = y_ref[...].astype(jnp.float32)             # (tile_r, 128), 0/1

        def accumulate(pred_eff):
            # Two reductions per class: counts and positives; negatives are
            # derived in the wrapper (cnt - pos).  Sublane reduce keeps the
            # (C, 128) accumulators lane-dense.
            cnt_parts = []
            pos_parts = []
            for c in range(C):
                hit = pred_eff == c                     # (tile_r, 128)
                cnt_parts.append(jnp.sum(jnp.where(hit, 1.0, 0.0),
                                         axis=0, keepdims=True))   # (1, 128)
                pos_parts.append(jnp.sum(jnp.where(hit, yf, 0.0),
                                         axis=0, keepdims=True))   # (1, 128)
            cnt_ref[0, :, :] = cnt_ref[0, :, :] + jnp.concatenate(cnt_parts, 0)
            pos_ref[0, :, :] = pos_ref[0, :, :] + jnp.concatenate(pos_parts, 0)

        if always_full:
            # Statically no ragged/padded/duplicated block anywhere.
            accumulate(pred)
        else:
            blk = pl.program_id(0) * pl.num_programs(1) + t   # global row-block
            is_full = (blk + 1) * (tile_r * _LANES) <= n_valid

            @pl.when(is_full)
            def _fast():
                accumulate(pred)

            @pl.when(jnp.logical_not(is_full))
            def _tail():
                # Boundary / duplicated block: mask samples with index >= N.
                row0 = blk * tile_r
                r_iota = jax.lax.broadcasted_iota(jnp.int32, (tile_r, _LANES), 0)
                l_iota = jax.lax.broadcasted_iota(jnp.int32, (tile_r, _LANES), 1)
                sample = (row0 + r_iota) * _LANES + l_iota
                valid = sample < n_valid
                accumulate(jnp.where(valid, pred, jnp.int32(-1)))

    return kernel


@functools.partial(jax.jit, static_argnames=("tile_r",))
def auroc(input_probs: jax.Array, label: jax.Array, *, tile_r=None):
    """input_probs: (N, C) float (f32/bf16); label: (N,) {0,1}.

    Returns scalar float32 AUROC of the argmax-index predictions
    (== sklearn.metrics.roc_auc_score(label, argmax(input_probs, -1))).
    """
    N, C = input_probs.shape
    R = pl.cdiv(N, _LANES)                   # 128-sample rows
    n_pad = R * _LANES - N                   # <=127 rows of pad only

    x = input_probs
    y = label
    if n_pad:
        x = jnp.pad(x, ((0, n_pad), (0, 0)))
        y = jnp.pad(y, ((0, n_pad),))
    # One fused relayout copy: samples lane-dense, 128/row sublane-dense.
    x_t = jnp.transpose(x).reshape(C, R, _LANES)          # (C, R, 128)
    y2 = y.reshape(R, _LANES).astype(jnp.bfloat16)        # (R, 128), 0/1 exact

    x_bytes = jnp.dtype(input_probs.dtype).itemsize
    if tile_r is None:
        # Size double-buffered input blocks to ~12 MiB (fits every generation
        # once vmem_limit is raised to 32 MiB); cap at 2048 rows = 256K samples.
        row_bytes = C * _LANES * x_bytes + _LANES * 2
        tile_r = min(2048, (12 * 1024 * 1024) // (2 * row_bytes))
        tile_r = max(32, (tile_r // 32) * 32)
    if tile_r >= R:
        tile_r = R                            # single full-extent block

    B = pl.cdiv(R, tile_r)                    # row-blocks of samples
    P = 2 if B >= 2 else 1                    # parallel slices (v7x megacore)
    T = pl.cdiv(B, P)                         # blocks per slice
    always_full = (n_pad == 0) and (R % tile_r == 0) and (B == P * T)

    def x_index(p, t):
        return (0, jnp.minimum(p * T + t, B - 1), 0)      # clamp empty blocks

    def y_index(p, t):
        return (jnp.minimum(p * T + t, B - 1), 0)

    kernel = _make_hist_kernel(n_classes=C, tile_r=tile_r, n_valid=N,
                               always_full=always_full)

    cost = pl.CostEstimate(
        flops=6 * N * C,
        transcendentals=0,
        bytes_accessed=R * _LANES * (C * x_bytes + 2) + 2 * P * C * _LANES * 4,
    )

    pos_out, cnt_out = pl.pallas_call(
        kernel,
        out_shape=(jax.ShapeDtypeStruct((P, C, _LANES), jnp.float32),
                   jax.ShapeDtypeStruct((P, C, _LANES), jnp.float32)),
        grid_spec=pltpu.PrefetchScalarGridSpec(
            num_scalar_prefetch=0,
            grid=(P, T),
            in_specs=[
                pl.BlockSpec((C, tile_r, _LANES), x_index),
                pl.BlockSpec((tile_r, _LANES), y_index),
            ],
            out_specs=[
                pl.BlockSpec((1, C, _LANES), lambda p, t: (p, 0, 0)),
                pl.BlockSpec((1, C, _LANES), lambda p, t: (p, 0, 0)),
            ],
        ),
        compiler_params=pltpu.CompilerParams(
            dimension_semantics=("parallel", "arbitrary"),
            vmem_limit_bytes=32 * 1024 * 1024,
        ),
        cost_estimate=cost,
    )(x_t, y2)

    # Tiny finalize (pure JAX): collapse lanes/slices, then the C-length
    # Mann-Whitney contraction.  Kept outside the kernel so the parallel
    # slices stay independent (v7x-safe).
    pos_hist = jnp.sum(pos_out, axis=(0, 2))              # (C,)
    cnt_hist = jnp.sum(cnt_out, axis=(0, 2))              # (C,)
    neg_hist = cnt_hist - pos_hist
    p_tot = jnp.sum(pos_hist)
    q_tot = jnp.sum(neg_hist)
    cum_neg = jnp.cumsum(neg_hist) - neg_hist             # negatives with class < c
    num = jnp.sum(pos_hist * (cum_neg + 0.5 * neg_hist))
    return num / (p_tot * q_tot)                          # NaN if single-class


def auroc_ref(x, y):
    """Pure-JAX reference (same math as sklearn binary roc_auc_score)."""
    s = jnp.argmax(x, axis=-1).astype(jnp.float32)
    yf = y.astype(jnp.float32)
    pair = yf[:, None] * (1.0 - yf)[None, :]
    gt = (s[:, None] > s[None, :]).astype(jnp.float32)
    eq = (s[:, None] == s[None, :]).astype(jnp.float32)
    return jnp.sum(pair * (gt + 0.5 * eq)) / (jnp.sum(yf) * jnp.sum(1.0 - yf))


if __name__ == "__main__":
    key = jax.random.PRNGKey(0)
    k1, k2, k3, k4 = jax.random.split(key, 4)

    # Case 1: small, single full-extent block with a padded tail (300 % 128 != 0).
    N1, C1 = 300, 4
    logits1 = jax.random.normal(k1, (N1, C1), dtype=jnp.float32)
    probs1 = jax.nn.softmax(logits1, axis=-1)
    label1 = jax.random.bernoulli(k2, 0.5, (N1,)).astype(jnp.int32)
    label1 = label1.at[0].set(0).at[1].set(1)     # ensure both classes present
    s1 = auroc(probs1, label1)
    jax.block_until_ready(s1)
    r1 = auroc_ref(probs1, label1)
    assert jnp.isfinite(s1), "AUROC is not finite"
    assert jnp.allclose(s1, r1, atol=1e-5), (float(s1), float(r1))

    # Case 2: forced small tile -> exercises the tiled grid, the fast path,
    # the masked ragged/padded tail, and the clamped (empty) duplicate block
    # on the parallel slice.
    N2, C2 = 8965, 5
    logits2 = jax.random.normal(k3, (N2, C2), dtype=jnp.float32)
    probs2 = jax.nn.softmax(logits2, axis=-1)
    label2 = jax.random.bernoulli(k4, 0.4, (N2,)).astype(jnp.int32)
    label2 = label2.at[0].set(0).at[1].set(1)
    s2 = auroc(probs2, label2, tile_r=32)
    jax.block_until_ready(s2)
    r2 = auroc_ref(probs2, label2)
    assert jnp.allclose(s2, r2, atol=1e-5), (float(s2), float(r2))

    print("KERNEL_OK")
</pallas_src>

<mosaic_0001>
module attributes {stable_mosaic.version = 11 : i64} {
  func.func @kernel(%arg0: i32, %arg1: i32, %arg2: memref<4x3x128xf32, #tpu.memory_space<vmem>>, %arg3: memref<3x128xbf16, #tpu.memory_space<vmem>>, %arg4: memref<1x4x128xf32, #tpu.memory_space<vmem>>, %arg5: memref<1x4x128xf32, #tpu.memory_space<vmem>>) attributes {dimension_semantics = [#tpu.dimension_semantics<parallel>, #tpu.dimension_semantics<arbitrary>], iteration_bounds = array<i64: 1, 1>, scalar_prefetch = 0 : i64, scratch_operands = 0 : i64, tpu.core_type = #tpu.core_type<tc>, window_params = [{transform_indices = @transform_0, window_bounds = array<i64: 4, 3, 128>}, {transform_indices = @transform_1, window_bounds = array<i64: 3, 128>}, {transform_indices = @transform_2, window_bounds = array<i64: 1, 4, 128>}, {transform_indices = @transform_3, window_bounds = array<i64: 1, 4, 128>}]} {
    %c0_i32 = arith.constant 0 : i32
    %0 = arith.cmpi eq, %arg1, %c0_i32 : i32
    %1 = arith.extui %0 : i1 to i32
    %c0_i32_0 = arith.constant 0 : i32
    %2 = arith.cmpi ne, %1, %c0_i32_0 : i32
    scf.if %2 {
      %cst = arith.constant 0.000000e+00 : f32
      %35 = vector.broadcast %cst : f32 to vector<1x4x128xf32>
      %c0_16 = arith.constant 0 : index
      %c0_17 = arith.constant 0 : index
      %c0_18 = arith.constant 0 : index
      %36 = vector.load %arg4[%c0_16, %c0_17, %c0_18] : memref<1x4x128xf32, #tpu.memory_space<vmem>>, vector<1x4x128xf32>
      tpu.vector_store %arg4[%c0_16, %c0_17, %c0_18], %35 {strides = array<i32>} : memref<1x4x128xf32, #tpu.memory_space<vmem>>, vector<1x4x128xf32>,
      %cst_19 = arith.constant 0.000000e+00 : f32
      %37 = vector.broadcast %cst_19 : f32 to vector<1x4x128xf32>
      %c0_20 = arith.constant 0 : index
      %c0_21 = arith.constant 0 : index
      %c0_22 = arith.constant 0 : index
      %38 = vector.load %arg5[%c0_20, %c0_21, %c0_22] : memref<1x4x128xf32, #tpu.memory_space<vmem>>, vector<1x4x128xf32>
      tpu.vector_store %arg5[%c0_20, %c0_21, %c0_22], %37 {strides = array<i32>} : memref<1x4x128xf32, #tpu.memory_space<vmem>>, vector<1x4x128xf32>,
    } else {
    }
    %c0 = arith.constant 0 : index
    %c0_1 = arith.constant 0 : index
    %c0_2 = arith.constant 0 : index
    %3 = vector.load %arg2[%c0, %c0_1, %c0_2] : memref<4x3x128xf32, #tpu.memory_space<vmem>>, vector<1x3x128xf32>
    %4 = vector.shape_cast %3 : vector<1x3x128xf32> to vector<3x128xf32>
    %c0_i32_3 = arith.constant 0 : i32
    %5 = vector.broadcast %c0_i32_3 : i32 to vector<3x128xi32>
    %c1 = arith.constant 1 : index
    %c0_4 = arith.constant 0 : index
    %c0_5 = arith.constant 0 : index
    %6 = vector.load %arg2[%c1, %c0_4, %c0_5] : memref<4x3x128xf32, #tpu.memory_space<vmem>>, vector<1x3x128xf32>
    %7 = vector.shape_cast %6 : vector<1x3x128xf32> to vector<3x128xf32>
    %8 = arith.cmpf ogt, %7, %4 : vector<3x128xf32>
    %9 = arith.select %8, %7, %4 : vector<3x128xi1>, vector<3x128xf32>
    %c1_i32 = arith.constant 1 : i32
    %10 = vector.broadcast %c1_i32 : i32 to vector<3x128xi32>
    %11 = arith.select %8, %10, %5 : vector<3x128xi1>, vector<3x128xi32>
    %c2 = arith.constant 2 : index
    %c0_6 = arith.constant 0 : index
    %c0_7 = arith.constant 0 : index
    %12 = vector.load %arg2[%c2, %c0_6, %c0_7] : memref<4x3x128xf32, #tpu.memory_space<vmem>>, vector<1x3x128xf32>
    %13 = vector.shape_cast %12 : vector<1x3x128xf32> to vector<3x128xf32>
    %14 = arith.cmpf ogt, %13, %9 : vector<3x128xf32>
    %15 = arith.select %14, %13, %9 : vector<3x128xi1>, vector<3x128xf32>
    %c2_i32 = arith.constant 2 : i32
    %16 = vector.broadcast %c2_i32 : i32 to vector<3x128xi32>
    %17 = arith.select %14, %16, %11 : vector<3x128xi1>, vector<3x128xi32>
    %c3 = arith.constant 3 : index
    %c0_8 = arith.constant 0 : index
    %c0_9 = arith.constant 0 : index
    %18 = vector.load %arg2[%c3, %c0_8, %c0_9] : memref<4x3x128xf32, #tpu.memory_space<vmem>>, vector<1x3x128xf32>
    %19 = vector.shape_cast %18 : vector<1x3x128xf32> to vector<3x128xf32>
    %20 = arith.cmpf ogt, %19, %15 : vector<3x128xf32>
    %c3_i32 = arith.constant 3 : i32
    %21 = vector.broadcast %c3_i32 : i32 to vector<3x128xi32>
    %22 = arith.select %20, %21, %17 : vector<3x128xi1>, vector<3x128xi32>
    %c0_10 = arith.constant 0 : index
    %c0_11 = arith.constant 0 : index
    %23 = vector.load %arg3[%c0_10, %c0_11] : memref<3x128xbf16, #tpu.memory_space<vmem>>, vector<3x128xbf16>
    %24 = arith.extf %23 : vector<3x128xbf16> to vector<3x128xf32>
    %c1_i32_12 = arith.constant 1 : i32
    %25 = arith.muli %arg0, %c1_i32_12 : i32
    %26 = arith.addi %25, %arg1 : i32
    %c1_i32_13 = arith.constant 1 : i32
    %27 = arith.addi %26, %c1_i32_13 : i32
    %c384_i32 = arith.constant 384 : i32
    %28 = arith.muli %27, %c384_i32 : i32
    %c300_i32 = arith.constant 300 : i32
    %29 = arith.cmpi sle, %28, %c300_i32 : i32
    %30 = arith.extui %29 : i1 to i32
    %c0_i32_14 = arith.constant 0 : i32
    %31 = arith.cmpi ne, %30, %c0_i32_14 : i32
    scf.if %31 {
      %c0_i32_16 = arith.constant 0 : i32
      %35 = vector.broadcast %c0_i32_16 : i32 to vector<3x128xi32>
      %36 = arith.cmpi eq, %22, %35 : vector<3x128xi32>
      %cst = arith.constant 1.000000e+00 : f32
      %cst_17 = arith.constant 0.000000e+00 : f32
      %37 = vector.broadcast %cst : f32 to vector<3x128xf32>
      %38 = vector.broadcast %cst_17 : f32 to vector<3x128xf32>
      %39 = arith.select %36, %37, %38 : vector<3x128xi1>, vector<3x128xf32>
      %cst_18 = arith.constant dense<0.000000e+00> : vector<128xf32>
      %40 = vector.multi_reduction <add>, %39, %cst_18 [0] : vector<3x128xf32> to vector<128xf32>
      %41 = vector.shape_cast %40 : vector<128xf32> to vector<1x128xf32>
      %cst_19 = arith.constant 0.000000e+00 : f32
      %42 = vector.broadcast %cst_19 : f32 to vector<3x128xf32>
      %43 = arith.select %36, %24, %42 : vector<3x128xi1>, vector<3x128xf32>
      %cst_20 = arith.constant dense<0.000000e+00> : vector<128xf32>
      %44 = vector.multi_reduction <add>, %43, %cst_20 [0] : vector<3x128xf32> to vector<128xf32>
      %45 = vector.shape_cast %44 : vector<128xf32> to vector<1x128xf32>
      %c1_i32_21 = arith.constant 1 : i32
      %46 = vector.broadcast %c1_i32_21 : i32 to vector<3x128xi32>
      %47 = arith.cmpi eq, %22, %46 : vector<3x128xi32>
      %cst_22 = arith.constant 1.000000e+00 : f32
      %cst_23 = arith.constant 0.000000e+00 : f32
      %48 = vector.broadcast %cst_22 : f32 to vector<3x128xf32>
      %49 = vector.broadcast %cst_23 : f32 to vector<3x128xf32>
      %50 = arith.select %47, %48, %49 : vector<3x128xi1>, vector<3x128xf32>
      %cst_24 = arith.constant dense<0.000000e+00> : vector<128xf32>
      %51 = vector.multi_reduction <add>, %50, %cst_24 [0] : vector<3x128xf32> to vector<128xf32>
      %52 = vector.shape_cast %51 : vector<128xf32> to vector<1x128xf32>
      %cst_25 = arith.constant 0.000000e+00 : f32
      %53 = vector.broadcast %cst_25 : f32 to vector<3x128xf32>
      %54 = arith.select %47, %24, %53 : vector<3x128xi1>, vector<3x128xf32>
      %cst_26 = arith.constant dense<0.000000e+00> : vector<128xf32>
      %55 = vector.multi_reduction <add>, %54, %cst_26 [0] : vector<3x128xf32> to vector<128xf32>
      %56 = vector.shape_cast %55 : vector<128xf32> to vector<1x128xf32>
      %c2_i32_27 = arith.constant 2 : i32
      %57 = vector.broadcast %c2_i32_27 : i32 to vector<3x128xi32>
      %58 = arith.cmpi eq, %22, %57 : vector<3x128xi32>
      %cst_28 = arith.constant 1.000000e+00 : f32
      %cst_29 = arith.constant 0.000000e+00 : f32
      %59 = vector.broadcast %cst_28 : f32 to vector<3x128xf32>
      %60 = vector.broadcast %cst_29 : f32 to vector<3x128xf32>
      %61 = arith.select %58, %59, %60 : vector<3x128xi1>, vector<3x128xf32>
      %cst_30 = arith.constant dense<0.000000e+00> : vector<128xf32>
      %62 = vector.multi_reduction <add>, %61, %cst_30 [0] : vector<3x128xf32> to vector<128xf32>
      %63 = vector.shape_cast %62 : vector<128xf32> to vector<1x128xf32>
      %cst_31 = arith.constant 0.000000e+00 : f32
      %64 = vector.broadcast %cst_31 : f32 to vector<3x128xf32>
      %65 = arith.select %58, %24, %64 : vector<3x128xi1>, vector<3x128xf32>
      %cst_32 = arith.constant dense<0.000000e+00> : vector<128xf32>
      %66 = vector.multi_reduction <add>, %65, %cst_32 [0] : vector<3x128xf32> to vector<128xf32>
      %67 = vector.shape_cast %66 : vector<128xf32> to vector<1x128xf32>
      %c3_i32_33 = arith.constant 3 : i32
      %68 = vector.broadcast %c3_i32_33 : i32 to vector<3x128xi32>
      %69 = arith.cmpi eq, %22, %68 : vector<3x128xi32>
      %cst_34 = arith.constant 1.000000e+00 : f32
      %cst_35 = arith.constant 0.000000e+00 : f32
      %70 = vector.broadcast %cst_34 : f32 to vector<3x128xf32>
      %71 = vector.broadcast %cst_35 : f32 to vector<3x128xf32>
      %72 = arith.select %69, %70, %71 : vector<3x128xi1>, vector<3x128xf32>
      %cst_36 = arith.constant dense<0.000000e+00> : vector<128xf32>
      %73 = vector.multi_reduction <add>, %72, %cst_36 [0] : vector<3x128xf32> to vector<128xf32>
      %74 = vector.shape_cast %73 : vector<128xf32> to vector<1x128xf32>
      %cst_37 = arith.constant 0.000000e+00 : f32
      %75 = vector.broadcast %cst_37 : f32 to vector<3x128xf32>
      %76 = arith.select %69, %24, %75 : vector<3x128xi1>, vector<3x128xf32>
      %cst_38 = arith.constant dense<0.000000e+00> : vector<128xf32>
      %77 = vector.multi_reduction <add>, %76, %cst_38 [0] : vector<3x128xf32> to vector<128xf32>
      %78 = vector.shape_cast %77 : vector<128xf32> to vector<1x128xf32>
      %c0_39 = arith.constant 0 : index
      %c0_40 = arith.constant 0 : index
      %c0_41 = arith.constant 0 : index
      %79 = vector.load %arg5[%c0_39, %c0_40, %c0_41] : memref<1x4x128xf32, #tpu.memory_space<vmem>>, vector<1x4x128xf32>
      %80 = vector.shape_cast %79 : vector<1x4x128xf32> to vector<4x128xf32>
      %81 = tpu.concatenate %41, %52, %63, %74 in 0 : vector<1x128xf32>, vector<1x128xf32>, vector<1x128xf32>, vector<1x128xf32> -> vector<4x128xf32>
      %82 = arith.addf %80, %81 : vector<4x128xf32>
      %c0_42 = arith.constant 0 : index
      %c0_43 = arith.constant 0 : index
      %c0_44 = arith.constant 0 : index
      %83 = vector.load %arg5[%c0_42, %c0_43, %c0_44] : memref<1x4x128xf32, #tpu.memory_space<vmem>>, vector<1x4x128xf32>
      %84 = vector.shape_cast %83 : vector<1x4x128xf32> to vector<4x128xf32>
      %85 = vector.shape_cast %82 : vector<4x128xf32> to vector<1x4x128xf32>
      tpu.vector_store %arg5[%c0_42, %c0_43, %c0_44], %85 {strides = array<i32>} : memref<1x4x128xf32, #tpu.memory_space<vmem>>, vector<1x4x128xf32>,
      %c0_45 = arith.constant 0 : index
      %c0_46 = arith.constant 0 : index
      %c0_47 = arith.constant 0 : index
      %86 = vector.load %arg4[%c0_45, %c0_46, %c0_47] : memref<1x4x128xf32, #tpu.memory_space<vmem>>, vector<1x4x128xf32>
      %87 = vector.shape_cast %86 : vector<1x4x128xf32> to vector<4x128xf32>
      %88 = tpu.concatenate %45, %56, %67, %78 in 0 : vector<1x128xf32>, vector<1x128xf32>, vector<1x128xf32>, vector<1x128xf32> -> vector<4x128xf32>
      %89 = arith.addf %87, %88 : vector<4x128xf32>
      %c0_48 = arith.constant 0 : index
      %c0_49 = arith.constant 0 : index
      %c0_50 = arith.constant 0 : index
      %90 = vector.load %arg4[%c0_48, %c0_49, %c0_50] : memref<1x4x128xf32, #tpu.memory_space<vmem>>, vector<1x4x128xf32>
      %91 = vector.shape_cast %90 : vector<1x4x128xf32> to vector<4x128xf32>
      %92 = vector.shape_cast %89 : vector<4x128xf32> to vector<1x4x128xf32>
      tpu.vector_store %arg4[%c0_48, %c0_49, %c0_50], %92 {strides = array<i32>} : memref<1x4x128xf32, #tpu.memory_space<vmem>>, vector<1x4x128xf32>,
    } else {
    }
    %true = arith.constant true
    %32 = arith.xori %29, %true : i1
    %33 = arith.extui %32 : i1 to i32
    %c0_i32_15 = arith.constant 0 : i32
    %34 = arith.cmpi ne, %33, %c0_i32_15 : i32
    scf.if %34 {
      %c3_i32_16 = arith.constant 3 : i32
      %35 = arith.muli %26, %c3_i32_16 : i32
      %36 = tpu.iota {dimensions = array<i32: 0>} : vector<3x128xi32>
      %37 = tpu.iota {dimensions = array<i32: 1>} : vector<3x128xi32>
      %38 = vector.broadcast %35 : i32 to vector<3x128xi32>
      %39 = arith.addi %38, %36 : vector<3x128xi32>
      %c128_i32 = arith.constant 128 : i32
      %40 = vector.broadcast %c128_i32 : i32 to vector<3x128xi32>
      %41 = arith.muli %39, %40 : vector<3x128xi32>
      %42 = arith.addi %41, %37 : vector<3x128xi32>
      %c300_i32_17 = arith.constant 300 : i32
      %43 = vector.broadcast %c300_i32_17 : i32 to vector<3x128xi32>
      %44 = arith.cmpi slt, %42, %43 : vector<3x128xi32>
      %c-1_i32 = arith.constant -1 : i32
      %45 = vector.broadcast %c-1_i32 : i32 to vector<3x128xi32>
      %46 = arith.select %44, %22, %45 : vector<3x128xi1>, vector<3x128xi32>
      %c0_i32_18 = arith.constant 0 : i32
      %47 = vector.broadcast %c0_i32_18 : i32 to vector<3x128xi32>
      %48 = arith.cmpi eq, %46, %47 : vector<3x128xi32>
      %cst = arith.constant 1.000000e+00 : f32
      %cst_19 = arith.constant 0.000000e+00 : f32
      %49 = vector.broadcast %cst : f32 to vector<3x128xf32>
      %50 = vector.broadcast %cst_19 : f32 to vector<3x128xf32>
      %51 = arith.select %48, %49, %50 : vector<3x128xi1>, vector<3x128xf32>
      %cst_20 = arith.constant dense<0.000000e+00> : vector<128xf32>
      %52 = vector.multi_reduction <add>, %51, %cst_20 [0] : vector<3x128xf32> to vector<128xf32>
      %53 = vector.shape_cast %52 : vector<128xf32> to vector<1x128xf32>
      %cst_21 = arith.constant 0.000000e+00 : f32
      %54 = vector.broadcast %cst_21 : f32 to vector<3x128xf32>
      %55 = arith.select %48, %24, %54 : vector<3x128xi1>, vector<3x128xf32>
      %cst_22 = arith.constant dense<0.000000e+00> : vector<128xf32>
      %56 = vector.multi_reduction <add>, %55, %cst_22 [0] : vector<3x128xf32> to vector<128xf32>
      %57 = vector.shape_cast %56 : vector<128xf32> to vector<1x128xf32>
      %c1_i32_23 = arith.constant 1 : i32
      %58 = vector.broadcast %c1_i32_23 : i32 to vector<3x128xi32>
      %59 = arith.cmpi eq, %46, %58 : vector<3x128xi32>
      %cst_24 = arith.constant 1.000000e+00 : f32
      %cst_25 = arith.constant 0.000000e+00 : f32
      %60 = vector.broadcast %cst_24 : f32 to vector<3x128xf32>
      %61 = vector.broadcast %cst_25 : f32 to vector<3x128xf32>
      %62 = arith.select %59, %60, %61 : vector<3x128xi1>, vector<3x128xf32>
      %cst_26 = arith.constant dense<0.000000e+00> : vector<128xf32>
      %63 = vector.multi_reduction <add>, %62, %cst_26 [0] : vector<3x128xf32> to vector<128xf32>
      %64 = vector.shape_cast %63 : vector<128xf32> to vector<1x128xf32>
      %cst_27 = arith.constant 0.000000e+00 : f32
      %65 = vector.broadcast %cst_27 : f32 to vector<3x128xf32>
      %66 = arith.select %59, %24, %65 : vector<3x128xi1>, vector<3x128xf32>
      %cst_28 = arith.constant dense<0.000000e+00> : vector<128xf32>
      %67 = vector.multi_reduction <add>, %66, %cst_28 [0] : vector<3x128xf32> to vector<128xf32>
      %68 = vector.shape_cast %67 : vector<128xf32> to vector<1x128xf32>
      %c2_i32_29 = arith.constant 2 : i32
      %69 = vector.broadcast %c2_i32_29 : i32 to vector<3x128xi32>
      %70 = arith.cmpi eq, %46, %69 : vector<3x128xi32>
      %cst_30 = arith.constant 1.000000e+00 : f32
      %cst_31 = arith.constant 0.000000e+00 : f32
      %71 = vector.broadcast %cst_30 : f32 to vector<3x128xf32>
      %72 = vector.broadcast %cst_31 : f32 to vector<3x128xf32>
      %73 = arith.select %70, %71, %72 : vector<3x128xi1>, vector<3x128xf32>
      %cst_32 = arith.constant dense<0.000000e+00> : vector<128xf32>
      %74 = vector.multi_reduction <add>, %73, %cst_32 [0] : vector<3x128xf32> to vector<128xf32>
      %75 = vector.shape_cast %74 : vector<128xf32> to vector<1x128xf32>
      %cst_33 = arith.constant 0.000000e+00 : f32
      %76 = vector.broadcast %cst_33 : f32 to vector<3x128xf32>
      %77 = arith.select %70, %24, %76 : vector<3x128xi1>, vector<3x128xf32>
      %cst_34 = arith.constant dense<0.000000e+00> : vector<128xf32>
      %78 = vector.multi_reduction <add>, %77, %cst_34 [0] : vector<3x128xf32> to vector<128xf32>
      %79 = vector.shape_cast %78 : vector<128xf32> to vector<1x128xf32>
      %c3_i32_35 = arith.constant 3 : i32
      %80 = vector.broadcast %c3_i32_35 : i32 to vector<3x128xi32>
      %81 = arith.cmpi eq, %46, %80 : vector<3x128xi32>
      %cst_36 = arith.constant 1.000000e+00 : f32
      %cst_37 = arith.constant 0.000000e+00 : f32
      %82 = vector.broadcast %cst_36 : f32 to vector<3x128xf32>
      %83 = vector.broadcast %cst_37 : f32 to vector<3x128xf32>
      %84 = arith.select %81, %82, %83 : vector<3x128xi1>, vector<3x128xf32>
      %cst_38 = arith.constant dense<0.000000e+00> : vector<128xf32>
      %85 = vector.multi_reduction <add>, %84, %cst_38 [0] : vector<3x128xf32> to vector<128xf32>
      %86 = vector.shape_cast %85 : vector<128xf32> to vector<1x128xf32>
      %cst_39 = arith.constant 0.000000e+00 : f32
      %87 = vector.broadcast %cst_39 : f32 to vector<3x128xf32>
      %88 = arith.select %81, %24, %87 : vector<3x128xi1>, vector<3x128xf32>
      %cst_40 = arith.constant dense<0.000000e+00> : vector<128xf32>
      %89 = vector.multi_reduction <add>, %88, %cst_40 [0] : vector<3x128xf32> to vector<128xf32>
      %90 = vector.shape_cast %89 : vector<128xf32> to vector<1x128xf32>
      %c0_41 = arith.constant 0 : index
      %c0_42 = arith.constant 0 : index
      %c0_43 = arith.constant 0 : index
      %91 = vector.load %arg5[%c0_41, %c0_42, %c0_43] : memref<1x4x128xf32, #tpu.memory_space<vmem>>, vector<1x4x128xf32>
      %92 = vector.shape_cast %91 : vector<1x4x128xf32> to vector<4x128xf32>
      %93 = tpu.concatenate %53, %64, %75, %86 in 0 : vector<1x128xf32>, vector<1x128xf32>, vector<1x128xf32>, vector<1x128xf32> -> vector<4x128xf32>
      %94 = arith.addf %92, %93 : vector<4x128xf32>
      %c0_44 = arith.constant 0 : index
      %c0_45 = arith.constant 0 : index
      %c0_46 = arith.constant 0 : index
      %95 = vector.load %arg5[%c0_44, %c0_45, %c0_46] : memref<1x4x128xf32, #tpu.memory_space<vmem>>, vector<1x4x128xf32>
      %96 = vector.shape_cast %95 : vector<1x4x128xf32> to vector<4x128xf32>
      %97 = vector.shape_cast %94 : vector<4x128xf32> to vector<1x4x128xf32>
      tpu.vector_store %arg5[%c0_44, %c0_45, %c0_46], %97 {strides = array<i32>} : memref<1x4x128xf32, #tpu.memory_space<vmem>>, vector<1x4x128xf32>,
      %c0_47 = arith.constant 0 : index
      %c0_48 = arith.constant 0 : index
      %c0_49 = arith.constant 0 : index
      %98 = vector.load %arg4[%c0_47, %c0_48, %c0_49] : memref<1x4x128xf32, #tpu.memory_space<vmem>>, vector<1x4x128xf32>
      %99 = vector.shape_cast %98 : vector<1x4x128xf32> to vector<4x128xf32>
      %100 = tpu.concatenate %57, %68, %79, %90 in 0 : vector<1x128xf32>, vector<1x128xf32>, vector<1x128xf32>, vector<1x128xf32> -> vector<4x128xf32>
      %101 = arith.addf %99, %100 : vector<4x128xf32>
      %c0_50 = arith.constant 0 : index
      %c0_51 = arith.constant 0 : index
      %c0_52 = arith.constant 0 : index
      %102 = vector.load %arg4[%c0_50, %c0_51, %c0_52] : memref<1x4x128xf32, #tpu.memory_space<vmem>>, vector<1x4x128xf32>
      %103 = vector.shape_cast %102 : vector<1x4x128xf32> to vector<4x128xf32>
      %104 = vector.shape_cast %101 : vector<4x128xf32> to vector<1x4x128xf32>
      tpu.vector_store %arg4[%c0_50, %c0_51, %c0_52], %104 {strides = array<i32>} : memref<1x4x128xf32, #tpu.memory_space<vmem>>, vector<1x4x128xf32>,
    } else {
    }
    return
  }
  func.func @transform_0(%arg0: i32, %arg1: i32) -> (i32, i32, i32) {
    %c1_i32 = arith.constant 1 : i32
    %0 = arith.muli %arg0, %c1_i32 : i32
    %1 = arith.addi %0, %arg1 : i32
    %c0_i32 = arith.constant 0 : i32
    %2 = arith.minsi %1, %c0_i32 : i32
    %c0_i32_0 = arith.constant 0 : i32
    %c0_i32_1 = arith.constant 0 : i32
    %c0_i32_2 = arith.constant 0 : i32
    return %c0_i32_0, %2, %c0_i32_1 : i32, i32, i32
  }
  func.func @transform_1(%arg0: i32, %arg1: i32) -> (i32, i32) {
    %c1_i32 = arith.constant 1 : i32
    %0 = arith.muli %arg0, %c1_i32 : i32
    %1 = arith.addi %0, %arg1 : i32
    %c0_i32 = arith.constant 0 : i32
    %2 = arith.minsi %1, %c0_i32 : i32
    %c0_i32_0 = arith.constant 0 : i32
    %c0_i32_1 = arith.constant 0 : i32
    return %2, %c0_i32_0 : i32, i32
  }
  func.func @transform_2(%arg0: i32, %arg1: i32) -> (i32, i32, i32) {
    %c0_i32 = arith.constant 0 : i32
    %c0_i32_0 = arith.constant 0 : i32
    %c0_i32_1 = arith.constant 0 : i32
    return %arg0, %c0_i32, %c0_i32_0 : i32, i32, i32
  }
  func.func @transform_3(%arg0: i32, %arg1: i32) -> (i32, i32, i32) {
    %c0_i32 = arith.constant 0 : i32
    %c0_i32_0 = arith.constant 0 : i32
    %c0_i32_1 = arith.constant 0 : i32
    return %arg0, %c0_i32, %c0_i32_0 : i32, i32, i32
  }
}

</mosaic_0001>

<bundles_post_ra>
// kernel: sub.9
= control target key start
LH: loop header
LB: loop body
LE: loop exit
PB: predicated region body
PF: predicated region fallthrough
CT: control target
= control target key end

     0   :  { %s34_s0 = inlined_call_operand.vmem [shape: f32[4], index: 0, kind: input, shape index: {}]   ;;  %s35_s1 = inlined_call_operand.vmem [shape: f32[4], index: 1, kind: input, shape index: {}]   ;;  %s36_s2 = inlined_call_operand.vmem [shape: f32[4], index: 2, kind: output, shape index: {}]  }
   0x1   :  { %v3_v0 = vld [vmem:[%s34_s0] sm:$0x1] }
   0x2   :  { %v4_v1 = vld [vmem:[%s35_s1] sm:$0x1] }
   0x3   :  { %v7_v2 = vsub.f32 %v3_v0, %v4_v1 }
   0x5   :  { %9 = vst [vmem:[%s36_s2] sm:$0x1] %v7_v2 }

// kernel: auroc.1
= control target key start
LH: loop header
LB: loop body
LE: loop exit
PB: predicated region body
PF: predicated region fallthrough
CT: control target
= control target key end

     0   :  { %v185_v0 = vlaneseq  ;;  %v303_v1 = vmov 0.0   ;;  %v304_v8 = vmov 0   ;;  %vm197_vm4 = vcmask 1042432   ;;  %s376_s0 = inlined_call_operand.vmem [shape: f32[4,3,128], index: 0, kind: input, shape index: {}]   ;;  %s377_s2 = inlined_call_operand.vmem [shape: f32[1,4,128], index: 2, kind: output, shape index: {0}]   ;;  %s378_s3 = inlined_call_operand.vmem [shape: f32[1,4,128], index: 3, kind: output, shape index: {1}]   ;;  %s379_s1 = inlined_call_operand.vmem [shape: bf16[3,128], index: 1, kind: input, shape index: {}]  }
   0x1   :  { %71 = vst [vmem:[%s377_s2] sm:$0xf] %v303_v1  ;;  %v73_v2 = vld [vmem:[%s376_s0] sm:$0x7]  ;;  %v298_v3 = vld [vmem:[%s376_s0 + $0x4] sm:$0x7]  ;;  %72 = vst [vmem:[%s378_s3] sm:$0xf] %v303_v1 }
   0x2   :  { %v299_v4 = vld [vmem:[%s376_s0 + $0x8] sm:$0x7]  ;;  %vm76_vm0 = vcmp.gt.f32.partialorder %v298_v3, %v73_v2  ;;  %v186_v5 = vshrl.u32 %v185_v0, 7  ;;  %v188_v6 = vand.u32 127, %v185_v0  ;;  %v300_v10 = vld [vmem:[%s376_s0 + $0xc] sm:$0x7] }
   0x3   :  { %v77_v7 = vsel %vm76_vm0, %v298_v3, %v73_v2  ;;  %v78_v9 = vsel %vm76_vm0, 1, %v304_v8  ;;  %v88_v11 = vld [vmem:[%s379_s1] sm:$0x3]  ;;  %vm265_vm9 = vcmask 1040384   ;;  %vm267_vm10 = vcmask 1041408  }
   0x4   :  { %vm81_vm1 = vcmp.gt.f32.partialorder %v299_v4, %v77_v7  ;;  %v191_v12 = vmul.u32 128, %v186_v5  ;;  %v89_v17 = vunpack.c.l.bf16 %v88_v11 }
   0x5   :  { %v82_v13 = vsel %vm81_vm1, %v299_v4, %v77_v7  ;;  %v83_v14 = vsel %vm81_vm1, 2, %v78_v9 }
   0x6   :  { %vm86_vm2 = vcmp.gt.f32.partialorder %v300_v10, %v82_v13  ;;  %v192_v15 = vadd.s32 %v191_v12, %v188_v6 }
   0x7   :  { %v87_v16 = vsel %vm86_vm2, 3, %v83_v14 }
   0x8   :  { %vm193_vm3 = vcmp.lt.s32.totalorder %v192_v15, 300  ;;  %v264_v11 = vld [vmem:[%s378_s3] sm:$0xf] }
   0x9   :  { %v194_v18 = vsel %vm193_vm3, %v87_v16, 4294967295 }
   0xa   :  { %vm195_vm5 = vcmp.eq.s32.totalorder %v194_v18, 0  ;;  %vm213_vm6 = vcmp.eq.s32.totalorder %v194_v18, 1  ;;  %vm230_vm7 = vcmp.eq.s32.totalorder %v194_v18, 2  ;;  %vm247_vm8 = vcmp.eq.s32.totalorder %v194_v18, 3 }
   0xb   :  { %v196_v19 = vsel %vm195_vm5, 1.0, %v303_v1  ;;  %v205_v20 = vsel %vm195_vm5, %v89_v17, 0.0  ;;  %v214_v21 = vsel %vm213_vm6, 1.0, %v303_v1  ;;  %v222_v22 = vsel %vm213_vm6, %v89_v17, 0.0 }
   0xc   :  { %v198_v23 = vsel %vm197_vm4, %v196_v19, 0.0  ;;  %v215_v24 = vsel %vm197_vm4, %v214_v21, 0.0  ;;  %v231_v25 = vsel %vm230_vm7, 1.0, %v303_v1  ;;  %v248_v26 = vsel %vm247_vm8, 1.0, %v303_v1 }
   0xd   :  { %v199_v27 = vrot.slane %v198_v23, 4  ;;  %v216_v28 = vrot.slane %v215_v24, 4  ;;  %v232_v29 = vsel %vm197_vm4, %v231_v25, 0.0  ;;  %v249_v30 = vsel %vm197_vm4, %v248_v26, 0.0  ;;  %v272_v25 = vld [vmem:[%s377_s2] sm:$0xf] }
   0xe   :  { %v233_v31 = vrot.slane %v232_v29, 4  ;;  %v250_v32 = vrot.slane %v249_v30, 4  ;;  %v206_v33 = vsel %vm197_vm4, %v205_v20, 0.0  ;;  %v223_v34 = vsel %vm197_vm4, %v222_v22, 0.0 }
   0xf   :  { %v200_v35 = vadd.f32 %v199_v27, %v198_v23  ;;  %v217_v36 = vadd.f32 %v216_v28, %v215_v24  ;;  %v207_v37 = vrot.slane %v206_v33, 4  ;;  %v224_v38 = vrot.slane %v223_v34, 4 }
  0x10   :  { %v234_v39 = vadd.f32 %v233_v31, %v232_v29  ;;  %v251_v40 = vadd.f32 %v250_v32, %v249_v30  ;;  %v239_v41 = vsel %vm230_vm7, %v89_v17, 0.0  ;;  %v256_v42 = vsel %vm247_vm8, %v89_v17, 0.0 }
  0x11   :  { %v201_v43 = vrot.slane %v200_v35, 2  ;;  %v218_v44 = vrot.slane %v217_v36, 2  ;;  %v208_v45 = vadd.f32 %v207_v37, %v206_v33  ;;  %v225_v46 = vadd.f32 %v224_v38, %v223_v34 }
  0x12   :  { %v235_v47 = vrot.slane %v234_v39, 2  ;;  %v252_v48 = vrot.slane %v251_v40, 2  ;;  %v240_v49 = vsel %vm197_vm4, %v239_v41, 0.0  ;;  %v257_v50 = vsel %vm197_vm4, %v256_v42, 0.0 }
  0x13   :  { %v202_v51 = vadd.f32 %v201_v43, %v200_v35  ;;  %v219_v52 = vadd.f32 %v218_v44, %v217_v36  ;;  %v209_v53 = vrot.slane %v208_v45, 2  ;;  %v226_v54 = vrot.slane %v225_v46, 2 }
  0x14   :  { %v236_v55 = vadd.f32 %v235_v47, %v234_v39  ;;  %v253_v56 = vadd.f32 %v252_v48, %v251_v40  ;;  %v241_v57 = vrot.slane %v240_v49, 4  ;;  %v258_v58 = vrot.slane %v257_v50, 4 }
  0x15   :  { %v203_v59 = vrot.slane %v202_v51, 1  ;;  %v220_v60 = vrot.slane %v219_v52, 1  ;;  %v210_v61 = vadd.f32 %v209_v53, %v208_v45  ;;  %v227_v62 = vadd.f32 %v226_v54, %v225_v46 }
  0x16   :  { %v237_v63 = vrot.slane %v236_v55, 1  ;;  %v254_v0 = vrot.slane %v253_v56, 1  ;;  %v242_v1 = vadd.f32 %v241_v57, %v240_v49  ;;  %v259_v2 = vadd.f32 %v258_v58, %v257_v50 }
  0x17   :  { %v204_v3 = vadd.f32 %v203_v59, %v202_v51  ;;  %v221_v4 = vadd.f32 %v220_v60, %v219_v52  ;;  %v211_v5 = vrot.slane %v210_v61, 1  ;;  %v228_v6 = vrot.slane %v227_v62, 1 }
  0x18   :  { %v238_v7 = vadd.f32 %v237_v63, %v236_v55  ;;  %v255_v8 = vadd.f32 %v254_v0, %v253_v56  ;;  %v243_v9 = vrot.slane %v242_v1, 2  ;;  %v260_v10 = vrot.slane %v259_v2, 2 }
  0x19   :  { %v266_v12 = vsel %vm265_vm9, %v204_v3, %v221_v4  ;;  %v212_v13 = vadd.f32 %v211_v5, %v210_v61  ;;  %v229_v14 = vadd.f32 %v228_v6, %v227_v62 }
  0x1a   :  { %v268_v15 = vsel %vm267_vm10, %v266_v12, %v238_v7  ;;  %v244_v16 = vadd.f32 %v243_v9, %v242_v1  ;;  %v261_v17 = vadd.f32 %v260_v10, %v259_v2 }
  0x1b   :  { %v269_v18 = vsel %vm197_vm4, %v268_v15, %v255_v8  ;;  %v273_v22 = vsel %vm265_vm9, %v212_v13, %v229_v14 }
  0x1c   :  { %v270_v19 = vadd.f32 %v269_v18, %v264_v11  ;;  %v245_v20 = vrot.slane %v244_v16, 1  ;;  %v262_v21 = vrot.slane %v261_v17, 1 }
  0x1e   :  { %271 = vst [vmem:[%s378_s3] sm:$0xf] %v270_v19  ;;  %v246_v23 = vadd.f32 %v245_v20, %v244_v16  ;;  %v263_v24 = vadd.f32 %v262_v21, %v261_v17 }
  0x20   :  { %v274_v26 = vsel %vm267_vm10, %v273_v22, %v246_v23 }
  0x21   :  { %v275_v27 = vsel %vm197_vm4, %v274_v26, %v263_v24 }
  0x22   :  { %v276_v28 = vadd.f32 %v275_v27, %v272_v25 }
  0x24   :  { %277 = vst [vmem:[%s377_s2] sm:$0xf] %v276_v28 }

</bundles_post_ra>
